<compile_context>
chip_gen: v5e
topology: v5e:2x2
jax: 0.10.0
libtpu: 0.0.40
codegen_flags: <defaults>
</compile_context>

<pallas_src>
import functools

import jax
import jax.numpy as jnp
from jax import lax
from jax.experimental import pallas as pl
from jax.experimental.pallas import tpu as pltpu


_TR = 8           # images per row block (sublane-aligned)
_TC_MAX = 8192    # lanes per column tile
_CHUNK = 128      # lanes per vreg chunk (intra-chunk scan width)
_MIN_NCH_MXU = 8  # use MXU chunk-carry path only with >= this many chunks


def _lovasz_hinge_kernel(gts_ref, nerr_ref, gt_ref, *rest, tc, two_level):
    """One (TR, TC) tile of the per-image *sorted* (-errors) / labels.

    Column axis is the reduction axis: scan state (running label cumsum, last
    jaccard value) and the per-image loss are carried in VMEM scratch.
    """
    if two_level:
        pool_ref, bcast_ref, out_ref, cum_ref, prevj_ref, loss_ref = rest
    else:
        out_ref, cum_ref, prevj_ref, loss_ref = rest

    k = pl.program_id(1)
    nk = pl.num_programs(1)

    @pl.when(k == 0)
    def _init():
        cum_ref[...] = jnp.zeros_like(cum_ref)
        prevj_ref[...] = jnp.zeros_like(prevj_ref)
        loss_ref[...] = jnp.zeros_like(loss_ref)

    g_raw = gt_ref[...]                      # (TR, TC) bf16 sorted 0/1 labels
    g = g_raw.astype(jnp.float32)
    gts = gts_ref[...]                       # (TR, 1) total positives per image

    lane = lax.broadcasted_iota(jnp.int32, g.shape, dimension=1)
    lane_f = lane.astype(jnp.float32)

    if two_level:
        # (1) intra-chunk (128-lane) inclusive prefix: 7 masked roll levels.
        lane_in_chunk = jnp.bitwise_and(lane, _CHUNK - 1)
        c = g
        d = 1
        while d < _CHUNK:
            shifted = pltpu.roll(c, shift=d, axis=1)
            c = c + jnp.where(lane_in_chunk >= d, shifted, 0.0)
            d *= 2
        # (2) cross-chunk carry on the MXU: per-chunk totals (pooling matmul)
        #     then exclusive-chunk-prefix broadcast (second matmul).  All
        #     values are small integers -> exact in bf16 with f32 accumulate.
        chunk_sums = jnp.dot(g_raw, pool_ref[...],
                             preferred_element_type=jnp.float32)    # (TR, NCH)
        carry = jnp.dot(chunk_sums.astype(jnp.bfloat16), bcast_ref[...],
                        preferred_element_type=jnp.float32)         # (TR, TC)
        cum = cum_ref[...] + carry + c
    else:
        # Small tile: plain Hillis-Steele scan over the full lane axis.
        c = g
        d = 1
        while d < tc:
            shifted = pltpu.roll(c, shift=d, axis=1)
            c = c + jnp.where(lane >= d, shifted, 0.0)
            d *= 2
        cum = cum_ref[...] + c

    # 1-based global position is folded into the (TR, 1) side:
    #   union = gts + (pos - cum) = (gts + k*tc + 1) + (lane - cum)
    base = gts + (k * tc + 1).astype(jnp.float32)        # (TR, 1)
    inter = gts - cum
    union = base + (lane_f - cum)
    jacc = 1.0 - inter * pl.reciprocal(union)            # exact reciprocal

    # Lovasz grad = first difference of jaccard (carry last value across tiles)
    j_prev = pltpu.roll(jacc, shift=1, axis=1)
    j_prev = jnp.where(lane == 0, prevj_ref[...], j_prev)
    grad = jacc - j_prev

    # hinge errors = -(negated sort keys); relu in-kernel.
    relu_err = jnp.maximum(-nerr_ref[...], 0.0)
    loss_ref[...] += jnp.sum(relu_err * grad, axis=1, keepdims=True)

    # Carries from values already computed (static last-lane slices).
    cum_ref[...] = cum[:, tc - 1:tc]
    prevj_ref[...] = jacc[:, tc - 1:tc]

    @pl.when(k == nk - 1)
    def _finalize():
        out_ref[...] = loss_ref[...]


def lovasz_hinge_loss(logits, labels):
    """Binary Lovasz hinge loss with per_image=True (LovaszHingeLoss.forward).

    logits, labels: (B, C, H, W); channel dim is squeezed away (C is typically
    1), each image is flattened to P = C*H*W pixels.
    """
    assert logits.shape == labels.shape and logits.ndim == 4
    b = logits.shape[0]
    p = logits.shape[1] * logits.shape[2] * logits.shape[3]
    # f32 position / cumsum arithmetic is exact only below 2**24 pixels/image.
    assert p < (1 << 24), "per-image pixel count too large for f32 cumsum"

    lg = logits.reshape(b, p).astype(jnp.float32)
    lb = labels.reshape(b, p).astype(jnp.float32)

    signs = 2.0 * lb - 1.0
    neg_errors = lg * signs - 1.0            # == -(1 - logits*signs)

    # TODO(synk): per-image descending sort (torch.sort) has no clean Pallas
    # TPU equivalent; done with lax.sort_key_val in the wrapper (for large
    # images this XLA sort likely dominates end-to-end time -- profile first).
    neg_sorted, gt_sorted = lax.sort_key_val(neg_errors, lb, dimension=1)
    gts = jnp.sum(lb, axis=1, keepdims=True)                 # (B, 1)
    gt_sorted = gt_sorted.astype(jnp.bfloat16)               # exact for 0/1

    # ---- tile geometry ----------------------------------------------------
    bp = pl.cdiv(b, _TR) * _TR
    pp = pl.cdiv(p, _CHUNK) * _CHUNK
    if pp <= _TC_MAX:
        tc = pp
    else:
        tc = _TC_MAX
        pp = pl.cdiv(p, tc) * tc
    nch = tc // _CHUNK
    two_level = nch >= _MIN_NCH_MXU

    # Pad only ragged axes (loss-neutral: key=0 -> relu(-0)=0 contributes
    # nothing; labels=0 keep the cumsum fixed and the union strictly positive).
    if p != pp:
        neg_sorted = jnp.pad(neg_sorted, ((0, 0), (0, pp - p)))
        gt_sorted = jnp.pad(gt_sorted, ((0, 0), (0, pp - p)))
    if b != bp:
        neg_sorted = jnp.pad(neg_sorted, ((0, bp - b), (0, 0)))
        gt_sorted = jnp.pad(gt_sorted, ((0, bp - b), (0, 0)))
        gts = jnp.pad(gts, ((0, bp - b), (0, 0)))

    grid = (bp // _TR, pp // tc)

    in_specs = [
        pl.BlockSpec((_TR, 1), lambda r, k: (r, 0)),     # gts (f32)
        pl.BlockSpec((_TR, tc), lambda r, k: (r, k)),    # sorted -errors (f32)
        pl.BlockSpec((_TR, tc), lambda r, k: (r, k)),    # sorted labels (bf16)
    ]
    operands = [gts, neg_sorted, gt_sorted]

    if two_level:
        chunk_id = jnp.arange(tc, dtype=jnp.int32) // _CHUNK         # (tc,)
        chunk_ids = jnp.arange(nch, dtype=jnp.int32)
        pool = (chunk_id[:, None] == chunk_ids[None, :]).astype(jnp.bfloat16)
        bcast = (chunk_ids[:, None] < chunk_id[None, :]).astype(jnp.bfloat16)
        in_specs += [
            pl.BlockSpec((tc, nch), lambda r, k: (0, 0)),  # pooling matrix
            pl.BlockSpec((nch, tc), lambda r, k: (0, 0)),  # excl-prefix bcast
        ]
        operands += [pool, bcast]

    kernel = functools.partial(_lovasz_hinge_kernel, tc=tc, two_level=two_level)

    # NOTE: with B <= 8 the row (parallel) axis has a single block, so on v7x
    # only one TensorCore is used; batches >= 16 shard across both cores.
    losses = pl.pallas_call(
        kernel,
        out_shape=jax.ShapeDtypeStruct((bp, 1), jnp.float32),
        grid_spec=pltpu.PrefetchScalarGridSpec(
            num_scalar_prefetch=0,
            grid=grid,
            in_specs=in_specs,
            out_specs=pl.BlockSpec((_TR, 1), lambda r, k: (r, 0)),
            scratch_shapes=[
                pltpu.VMEM((_TR, 1), jnp.float32),   # running label cumsum
                pltpu.VMEM((_TR, 1), jnp.float32),   # last jaccard value carry
                pltpu.VMEM((_TR, 1), jnp.float32),   # per-image loss accum
            ],
        ),
        compiler_params=pltpu.CompilerParams(
            dimension_semantics=("parallel", "arbitrary"),
        ),
    )(*operands)

    return jnp.mean(losses[:b, 0])


def lovasz_hinge_loss_ref(logits, labels):
    """Pure-JAX reference mirroring the PyTorch implementation."""
    b = logits.shape[0]
    lg = logits.reshape(b, -1).astype(jnp.float32)
    lb = labels.reshape(b, -1).astype(jnp.float32)
    losses = []
    for i in range(b):
        signs = 2.0 * lb[i] - 1.0
        errors = 1.0 - lg[i] * signs
        order = jnp.argsort(-errors)
        e_s = errors[order]
        g_s = lb[i][order]
        total = g_s.sum()
        inter = total - jnp.cumsum(g_s)
        union = total + jnp.cumsum(1.0 - g_s)
        jacc = 1.0 - inter / union
        grad = jnp.concatenate([jacc[:1], jacc[1:] - jacc[:-1]])
        losses.append(jnp.dot(jnp.maximum(e_s, 0.0), grad))
    return jnp.mean(jnp.stack(losses))


if __name__ == "__main__":
    key = jax.random.PRNGKey(0)
    k1, k2, k3, k4 = jax.random.split(key, 4)

    # Small shape from the module spec (C squeezed away): exercises the
    # small-tile (full Hillis-Steele) path.
    B, C, H, W = 2, 1, 16, 16
    logits_s = jax.random.normal(k1, (B, C, H, W), dtype=jnp.float32)
    labels_s = (jax.random.uniform(k2, (B, C, H, W)) > 0.5).astype(jnp.float32)

    loss_s = jax.block_until_ready(lovasz_hinge_loss(logits_s, labels_s))
    ref_s = lovasz_hinge_loss_ref(logits_s, labels_s)
    assert jnp.allclose(loss_s, ref_s, atol=1e-4, rtol=1e-4), (loss_s, ref_s)

    # Slightly larger spatial size: exercises the two-level (MXU chunk-carry)
    # scan path.
    B2, H2, W2 = 2, 64, 64
    logits_l = jax.random.normal(k3, (B2, C, H2, W2), dtype=jnp.float32)
    labels_l = (jax.random.uniform(k4, (B2, C, H2, W2)) > 0.5).astype(jnp.float32)

    loss_l = jax.block_until_ready(lovasz_hinge_loss(logits_l, labels_l))
    ref_l = lovasz_hinge_loss_ref(logits_l, labels_l)
    assert jnp.allclose(loss_l, ref_l, atol=1e-4, rtol=1e-4), (loss_l, ref_l)

    print("KERNEL_OK")
</pallas_src>

<mosaic_0001>
module attributes {stable_mosaic.version = 11 : i64} {
  func.func @_lovasz_hinge_kernel(%arg0: i32, %arg1: i32, %arg2: memref<8x1xf32, #tpu.memory_space<vmem>>, %arg3: memref<8x256xf32, #tpu.memory_space<vmem>>, %arg4: memref<8x256xbf16, #tpu.memory_space<vmem>>, %arg5: memref<8x1xf32, #tpu.memory_space<vmem>>, %arg6: memref<8x1xf32, #tpu.memory_space<vmem>>, %arg7: memref<8x1xf32, #tpu.memory_space<vmem>>, %arg8: memref<8x1xf32, #tpu.memory_space<vmem>>) attributes {dimension_semantics = [#tpu.dimension_semantics<parallel>, #tpu.dimension_semantics<arbitrary>], iteration_bounds = array<i64: 1, 1>, scalar_prefetch = 0 : i64, scratch_operands = 3 : i64, tpu.core_type = #tpu.core_type<tc>, window_params = [{transform_indices = @transform_0, window_bounds = array<i64: 8, 1>}, {transform_indices = @transform_1, window_bounds = array<i64: 8, 256>}, {transform_indices = @transform_2, window_bounds = array<i64: 8, 256>}, {transform_indices = @transform_3, window_bounds = array<i64: 8, 1>}]} {
    %c0_i32 = arith.constant 0 : i32
    %0 = arith.cmpi eq, %arg1, %c0_i32 : i32
    %1 = arith.extui %0 : i1 to i32
    %c0_i32_0 = arith.constant 0 : i32
    %2 = arith.cmpi ne, %1, %c0_i32_0 : i32
    scf.if %2 {
      %cst_42 = arith.constant 0.000000e+00 : f32
      %99 = vector.broadcast %cst_42 : f32 to vector<8x1xf32>
      %c0_43 = arith.constant 0 : index
      %c0_44 = arith.constant 0 : index
      %100 = vector.load %arg6[%c0_43, %c0_44] : memref<8x1xf32, #tpu.memory_space<vmem>>, vector<8x1xf32>
      tpu.vector_store %arg6[%c0_43, %c0_44], %99 {strides = array<i32>} : memref<8x1xf32, #tpu.memory_space<vmem>>, vector<8x1xf32>,
      %cst_45 = arith.constant 0.000000e+00 : f32
      %101 = vector.broadcast %cst_45 : f32 to vector<8x1xf32>
      %c0_46 = arith.constant 0 : index
      %c0_47 = arith.constant 0 : index
      %102 = vector.load %arg7[%c0_46, %c0_47] : memref<8x1xf32, #tpu.memory_space<vmem>>, vector<8x1xf32>
      tpu.vector_store %arg7[%c0_46, %c0_47], %101 {strides = array<i32>} : memref<8x1xf32, #tpu.memory_space<vmem>>, vector<8x1xf32>,
      %cst_48 = arith.constant 0.000000e+00 : f32
      %103 = vector.broadcast %cst_48 : f32 to vector<8x1xf32>
      %c0_49 = arith.constant 0 : index
      %c0_50 = arith.constant 0 : index
      %104 = vector.load %arg8[%c0_49, %c0_50] : memref<8x1xf32, #tpu.memory_space<vmem>>, vector<8x1xf32>
      tpu.vector_store %arg8[%c0_49, %c0_50], %103 {strides = array<i32>} : memref<8x1xf32, #tpu.memory_space<vmem>>, vector<8x1xf32>,
    } else {
    }
    %c0 = arith.constant 0 : index
    %c0_1 = arith.constant 0 : index
    %3 = vector.load %arg4[%c0, %c0_1] : memref<8x256xbf16, #tpu.memory_space<vmem>>, vector<8x256xbf16>
    %4 = arith.extf %3 : vector<8x256xbf16> to vector<8x256xf32>
    %c0_2 = arith.constant 0 : index
    %c0_3 = arith.constant 0 : index
    %5 = vector.load %arg2[%c0_2, %c0_3] : memref<8x1xf32, #tpu.memory_space<vmem>>, vector<8x1xf32>
    %6 = tpu.iota {dimensions = array<i32: 1>} : vector<8x256xi32>
    %7 = arith.sitofp %6 : vector<8x256xi32> to vector<8x256xf32>
    %c1_i32 = arith.constant 1 : i32
    %8 = tpu.dynamic_rotate %4 by %c1_i32 dim 1 : vector<8x256xf32>, i32 -> vector<8x256xf32>
    %c1_i32_4 = arith.constant 1 : i32
    %9 = vector.broadcast %c1_i32_4 : i32 to vector<8x256xi32>
    %10 = arith.cmpi sge, %6, %9 : vector<8x256xi32>
    %cst = arith.constant 0.000000e+00 : f32
    %11 = vector.broadcast %cst : f32 to vector<8x256xf32>
    %12 = arith.select %10, %8, %11 : vector<8x256xi1>, vector<8x256xf32>
    %13 = arith.addf %4, %12 : vector<8x256xf32>
    %c2_i32 = arith.constant 2 : i32
    %14 = tpu.dynamic_rotate %13 by %c2_i32 dim 1 : vector<8x256xf32>, i32 -> vector<8x256xf32>
    %c2_i32_5 = arith.constant 2 : i32
    %15 = vector.broadcast %c2_i32_5 : i32 to vector<8x256xi32>
    %16 = arith.cmpi sge, %6, %15 : vector<8x256xi32>
    %cst_6 = arith.constant 0.000000e+00 : f32
    %17 = vector.broadcast %cst_6 : f32 to vector<8x256xf32>
    %18 = arith.select %16, %14, %17 : vector<8x256xi1>, vector<8x256xf32>
    %19 = arith.addf %13, %18 : vector<8x256xf32>
    %c4_i32 = arith.constant 4 : i32
    %20 = tpu.dynamic_rotate %19 by %c4_i32 dim 1 : vector<8x256xf32>, i32 -> vector<8x256xf32>
    %c4_i32_7 = arith.constant 4 : i32
    %21 = vector.broadcast %c4_i32_7 : i32 to vector<8x256xi32>
    %22 = arith.cmpi sge, %6, %21 : vector<8x256xi32>
    %cst_8 = arith.constant 0.000000e+00 : f32
    %23 = vector.broadcast %cst_8 : f32 to vector<8x256xf32>
    %24 = arith.select %22, %20, %23 : vector<8x256xi1>, vector<8x256xf32>
    %25 = arith.addf %19, %24 : vector<8x256xf32>
    %c8_i32 = arith.constant 8 : i32
    %26 = tpu.dynamic_rotate %25 by %c8_i32 dim 1 : vector<8x256xf32>, i32 -> vector<8x256xf32>
    %c8_i32_9 = arith.constant 8 : i32
    %27 = vector.broadcast %c8_i32_9 : i32 to vector<8x256xi32>
    %28 = arith.cmpi sge, %6, %27 : vector<8x256xi32>
    %cst_10 = arith.constant 0.000000e+00 : f32
    %29 = vector.broadcast %cst_10 : f32 to vector<8x256xf32>
    %30 = arith.select %28, %26, %29 : vector<8x256xi1>, vector<8x256xf32>
    %31 = arith.addf %25, %30 : vector<8x256xf32>
    %c16_i32 = arith.constant 16 : i32
    %32 = tpu.dynamic_rotate %31 by %c16_i32 dim 1 : vector<8x256xf32>, i32 -> vector<8x256xf32>
    %c16_i32_11 = arith.constant 16 : i32
    %33 = vector.broadcast %c16_i32_11 : i32 to vector<8x256xi32>
    %34 = arith.cmpi sge, %6, %33 : vector<8x256xi32>
    %cst_12 = arith.constant 0.000000e+00 : f32
    %35 = vector.broadcast %cst_12 : f32 to vector<8x256xf32>
    %36 = arith.select %34, %32, %35 : vector<8x256xi1>, vector<8x256xf32>
    %37 = arith.addf %31, %36 : vector<8x256xf32>
    %c32_i32 = arith.constant 32 : i32
    %38 = tpu.dynamic_rotate %37 by %c32_i32 dim 1 : vector<8x256xf32>, i32 -> vector<8x256xf32>
    %c32_i32_13 = arith.constant 32 : i32
    %39 = vector.broadcast %c32_i32_13 : i32 to vector<8x256xi32>
    %40 = arith.cmpi sge, %6, %39 : vector<8x256xi32>
    %cst_14 = arith.constant 0.000000e+00 : f32
    %41 = vector.broadcast %cst_14 : f32 to vector<8x256xf32>
    %42 = arith.select %40, %38, %41 : vector<8x256xi1>, vector<8x256xf32>
    %43 = arith.addf %37, %42 : vector<8x256xf32>
    %c64_i32 = arith.constant 64 : i32
    %44 = tpu.dynamic_rotate %43 by %c64_i32 dim 1 : vector<8x256xf32>, i32 -> vector<8x256xf32>
    %c64_i32_15 = arith.constant 64 : i32
    %45 = vector.broadcast %c64_i32_15 : i32 to vector<8x256xi32>
    %46 = arith.cmpi sge, %6, %45 : vector<8x256xi32>
    %cst_16 = arith.constant 0.000000e+00 : f32
    %47 = vector.broadcast %cst_16 : f32 to vector<8x256xf32>
    %48 = arith.select %46, %44, %47 : vector<8x256xi1>, vector<8x256xf32>
    %49 = arith.addf %43, %48 : vector<8x256xf32>
    %c128_i32 = arith.constant 128 : i32
    %50 = tpu.dynamic_rotate %49 by %c128_i32 dim 1 : vector<8x256xf32>, i32 -> vector<8x256xf32>
    %c128_i32_17 = arith.constant 128 : i32
    %51 = vector.broadcast %c128_i32_17 : i32 to vector<8x256xi32>
    %52 = arith.cmpi sge, %6, %51 : vector<8x256xi32>
    %cst_18 = arith.constant 0.000000e+00 : f32
    %53 = vector.broadcast %cst_18 : f32 to vector<8x256xf32>
    %54 = arith.select %52, %50, %53 : vector<8x256xi1>, vector<8x256xf32>
    %55 = arith.addf %49, %54 : vector<8x256xf32>
    %c0_19 = arith.constant 0 : index
    %c0_20 = arith.constant 0 : index
    %56 = vector.load %arg6[%c0_19, %c0_20] : memref<8x1xf32, #tpu.memory_space<vmem>>, vector<8x1xf32>
    %57 = vector.broadcast %56 : vector<8x1xf32> to vector<8x256xf32>
    %58 = arith.addf %57, %55 : vector<8x256xf32>
    %c256_i32 = arith.constant 256 : i32
    %59 = arith.muli %arg1, %c256_i32 : i32
    %c1_i32_21 = arith.constant 1 : i32
    %60 = arith.addi %59, %c1_i32_21 : i32
    %61 = arith.sitofp %60 : i32 to f32
    %62 = vector.broadcast %61 : f32 to vector<8x1xf32>
    %63 = arith.addf %5, %62 : vector<8x1xf32>
    %64 = vector.broadcast %5 : vector<8x1xf32> to vector<8x256xf32>
    %65 = arith.subf %64, %58 : vector<8x256xf32>
    %66 = arith.subf %7, %58 : vector<8x256xf32>
    %67 = vector.broadcast %63 : vector<8x1xf32> to vector<8x256xf32>
    %68 = arith.addf %67, %66 : vector<8x256xf32>
    %69 = tpu.reciprocal %68 : vector<8x256xf32> -> vector<8x256xf32>
    %70 = arith.mulf %65, %69 : vector<8x256xf32>
    %cst_22 = arith.constant 1.000000e+00 : f32
    %71 = vector.broadcast %cst_22 : f32 to vector<8x256xf32>
    %72 = arith.subf %71, %70 : vector<8x256xf32>
    %c1_i32_23 = arith.constant 1 : i32
    %73 = tpu.dynamic_rotate %72 by %c1_i32_23 dim 1 : vector<8x256xf32>, i32 -> vector<8x256xf32>
    %c0_i32_24 = arith.constant 0 : i32
    %74 = vector.broadcast %c0_i32_24 : i32 to vector<8x256xi32>
    %75 = arith.cmpi eq, %6, %74 : vector<8x256xi32>
    %c0_25 = arith.constant 0 : index
    %c0_26 = arith.constant 0 : index
    %76 = vector.load %arg7[%c0_25, %c0_26] : memref<8x1xf32, #tpu.memory_space<vmem>>, vector<8x1xf32>
    %77 = vector.shape_cast %76 : vector<8x1xf32> to vector<8x1xf32>
    %78 = vector.broadcast %77 : vector<8x1xf32> to vector<8x256xf32>
    %79 = arith.select %75, %78, %73 : vector<8x256xi1>, vector<8x256xf32>
    %80 = arith.subf %72, %79 : vector<8x256xf32>
    %c0_27 = arith.constant 0 : index
    %c0_28 = arith.constant 0 : index
    %81 = vector.load %arg3[%c0_27, %c0_28] : memref<8x256xf32, #tpu.memory_space<vmem>>, vector<8x256xf32>
    %cst_29 = arith.constant 0.000000e+00 : f32
    %82 = vector.broadcast %cst_29 : f32 to vector<8x256xf32>
    %83 = arith.subf %82, %81 : vector<8x256xf32>
    %cst_30 = arith.constant 0.000000e+00 : f32
    %84 = vector.broadcast %cst_30 : f32 to vector<8x256xf32>
    %85 = arith.maximumf %83, %84 : vector<8x256xf32>
    %c0_31 = arith.constant 0 : index
    %c0_32 = arith.constant 0 : index
    %86 = vector.load %arg8[%c0_31, %c0_32] : memref<8x1xf32, #tpu.memory_space<vmem>>, vector<8x1xf32>
    %87 = arith.mulf %85, %80 : vector<8x256xf32>
    %cst_33 = arith.constant dense<0.000000e+00> : vector<8xf32>
    %88 = vector.multi_reduction <add>, %87, %cst_33 [1] : vector<8x256xf32> to vector<8xf32>
    %89 = vector.shape_cast %88 : vector<8xf32> to vector<8x1xf32>
    %90 = arith.addf %86, %89 : vector<8x1xf32>
    %c0_34 = arith.constant 0 : index
    %c0_35 = arith.constant 0 : index
    %91 = vector.load %arg8[%c0_34, %c0_35] : memref<8x1xf32, #tpu.memory_space<vmem>>, vector<8x1xf32>
    tpu.vector_store %arg8[%c0_34, %c0_35], %90 {strides = array<i32>} : memref<8x1xf32, #tpu.memory_space<vmem>>, vector<8x1xf32>,
    %92 = vector.extract_strided_slice %58 {offsets = [0, 255], sizes = [8, 1], strides = [1, 1]} : vector<8x256xf32> to vector<8x1xf32>
    %c0_36 = arith.constant 0 : index
    %c0_37 = arith.constant 0 : index
    %93 = vector.load %arg6[%c0_36, %c0_37] : memref<8x1xf32, #tpu.memory_space<vmem>>, vector<8x1xf32>
    tpu.vector_store %arg6[%c0_36, %c0_37], %92 {strides = array<i32>} : memref<8x1xf32, #tpu.memory_space<vmem>>, vector<8x1xf32>,
    %94 = vector.extract_strided_slice %72 {offsets = [0, 255], sizes = [8, 1], strides = [1, 1]} : vector<8x256xf32> to vector<8x1xf32>
    %c0_38 = arith.constant 0 : index
    %c0_39 = arith.constant 0 : index
    %95 = vector.load %arg7[%c0_38, %c0_39] : memref<8x1xf32, #tpu.memory_space<vmem>>, vector<8x1xf32>
    tpu.vector_store %arg7[%c0_38, %c0_39], %94 {strides = array<i32>} : memref<8x1xf32, #tpu.memory_space<vmem>>, vector<8x1xf32>,
    %c0_i32_40 = arith.constant 0 : i32
    %96 = arith.cmpi eq, %arg1, %c0_i32_40 : i32
    %97 = arith.extui %96 : i1 to i32
    %c0_i32_41 = arith.constant 0 : i32
    %98 = arith.cmpi ne, %97, %c0_i32_41 : i32
    scf.if %98 {
      %c0_42 = arith.constant 0 : index
      %c0_43 = arith.constant 0 : index
      %99 = vector.load %arg8[%c0_42, %c0_43] : memref<8x1xf32, #tpu.memory_space<vmem>>, vector<8x1xf32>
      %c0_44 = arith.constant 0 : index
      %c0_45 = arith.constant 0 : index
      %100 = vector.load %arg5[%c0_44, %c0_45] : memref<8x1xf32, #tpu.memory_space<vmem>>, vector<8x1xf32>
      tpu.vector_store %arg5[%c0_44, %c0_45], %99 {strides = array<i32>} : memref<8x1xf32, #tpu.memory_space<vmem>>, vector<8x1xf32>,
    } else {
    }
    return
  }
  func.func @transform_0(%arg0: i32, %arg1: i32) -> (i32, i32) {
    %c0_i32 = arith.constant 0 : i32
    %c0_i32_0 = arith.constant 0 : i32
    return %arg0, %c0_i32 : i32, i32
  }
  func.func @transform_1(%arg0: i32, %arg1: i32) -> (i32, i32) {
    %c0_i32 = arith.constant 0 : i32
    return %arg0, %arg1 : i32, i32
  }
  func.func @transform_2(%arg0: i32, %arg1: i32) -> (i32, i32) {
    %c0_i32 = arith.constant 0 : i32
    return %arg0, %arg1 : i32, i32
  }
  func.func @transform_3(%arg0: i32, %arg1: i32) -> (i32, i32) {
    %c0_i32 = arith.constant 0 : i32
    %c0_i32_0 = arith.constant 0 : i32
    return %arg0, %c0_i32 : i32, i32
  }
}

</mosaic_0001>

<bundles_post_ra>
// kernel: tpu_custom_call.1
= control target key start
LH: loop header
LB: loop body
LE: loop exit
PB: predicated region body
PF: predicated region fallthrough
CT: control target
= control target key end

     0   :  { %8 = vsyncpa [#allocation6], 0  ;;  %s304_s15 = smov [#allocation5]   ;;  %s385_s0 = inlined_call_operand.vmem [shape: f32[8,1], index: 0, kind: input, shape index: {}]   ;;  %s386_s1 = inlined_call_operand.hbm [shape: f32[8,256], index: 1, kind: input, shape index: {}]   ;;  %s387_s2 = inlined_call_operand.vmem [shape: bf16[8,256], index: 2, kind: input, shape index: {}]   ;;  %s388_s3 = inlined_call_operand.vmem [shape: f32[8,1], index: 3, kind: output, shape index: {}]  }
   0x1   :  { %s16_s14 = sshll.u32 %s386_s1, 4  ;;  %s18_s16 = sshll.u32 %s304_s15, 4  ;;  %s17_s14 = int_to_ptr.hbm [resolvable:$true] %s16_s14  ;;  %s19_s16 = int_to_ptr.vmem [resolvable:$true] %s18_s16 }
   0x2   :  { %21 = dma.hbm_to_vmem [thread:$0]  %s17_s14, 256, %s19_s16, [#allocation6]  }
   0x3   :  { %302 = dma.done.wait [#allocation6], 256  }
   0x4   :  { %303 = vsyncadd [#allocation6], 4294967040  ;;  %v36_v0 = vld [vmem:[%s387_s2] sm:$0xff]  ;;  %s305_s19 = smov 1   ;;  %v40_v4 = vlaneseq  ;;  %s306_s1 = smov 2   ;;  %vm32_vm10 = vcmask 7168  }
   0x5   :  { %v37_v1 = vunpack.c.l.bf16 %v36_v0  ;;  %v38_v2 = vunpack.c.h.bf16 %v36_v0  ;;  %s307_s2 = smov 4   ;;  %s308_s20 = smov 8   ;;  %v311_v42 = vmov 0.0   ;;  %v312_v43 = vmov 0   ;;  %v39_v52 = vld [vmem:[%s385_s0] sm:$0xff] }
   0x6   :  { %v341_v5 = vand.u32 127, %v40_v4  ;;  %s309_s21 = smov 16   ;;  %s310_s22 = smov 32   ;;  %33 = vst.msk [vmem:[#allocation2] sm:$0xff] %vm32_vm10, %v311_v42  ;;  %271 = vset.pattern.permute.xlu1 %v312_v43  ;;  %273 = vset.pattern.permute.xlu0 %v312_v43  ;;  %v154_v53 = vadd.f32 1.0, %v39_v52 }
   0x7   :  { %v266_v3 = vpack.i.bf16 %v38_v2, %v37_v1  ;;  %34 = vst.msk [vmem:[#allocation3] sm:$0xff] %vm32_vm10, %v311_v42  ;;  %272 = vset.pattern.permute.xlu2 %v312_v43  ;;  %s313_s23 = smov 64  }
   0x8   :  { %vm49_vm0 = vcmp.lt.s32.totalorder %v341_v5, 1  ;;  %vm52_vm1 = vcmp.ge.s32.totalorder %v341_v5, 1  ;;  %vm62_vm2 = vcmp.lt.s32.totalorder %v341_v5, 2  ;;  %vm65_vm3 = vcmp.ge.s32.totalorder %v341_v5, 2  ;;  %35 = vst.msk [vmem:[#allocation4] sm:$0xff] %vm32_vm10, %v311_v42 }
   0x9   :  { %267 = vrot.lane.b32.xlu0 %v266_v3, %s305_s19  ;;  %vm75_vm4 = vcmp.lt.s32.totalorder %v341_v5, 4  ;;  %vm78_vm5 = vcmp.ge.s32.totalorder %v341_v5, 4  ;;  %vm88_vm6 = vcmp.lt.s32.totalorder %v341_v5, 8  ;;  %vm91_vm7 = vcmp.ge.s32.totalorder %v341_v5, 8 }
   0xa   :  { %vm101_vm8 = vcmp.lt.s32.totalorder %v341_v5, 16  ;;  %vm104_vm9 = vcmp.ge.s32.totalorder %v341_v5, 16  ;;  %vm114_vm11 = vcmp.lt.s32.totalorder %v341_v5, 32  ;;  %vm117_vm12 = vcmp.ge.s32.totalorder %v341_v5, 32 }
   0xb   :  { %vm127_vm13 = vcmp.lt.s32.totalorder %v341_v5, 64  ;;  %vm130_vm14 = vcmp.ge.s32.totalorder %v341_v5, 64  ;;  %v42_v58 = vadd.s32 128, %v341_v5  ;;  %v43_v63 = vcvt.s32.f32 %v341_v5 }
   0xd   :  { %v142_v44 = vld [vmem:[#allocation2] sm:$0xff] }
  0x7b   :  { %v268_v6 = vpop.permute.xlu0 %267 }
  0x7c   :  { %v270_v7 = vunpack.i.h.bf16 %v268_v6  ;;  %v269_v8 = vunpack.i.l.bf16 %v268_v6 }
  0x7e   :  { %v50_v9 = vsel %vm49_vm0, %v269_v8, %v270_v7  ;;  %v51_v10 = vsel %vm49_vm0, %v270_v7, %v269_v8 }
  0x7f   :  { %v57_v11 = vadd.f32 %v50_v9, %v38_v2  ;;  %v54_v12 = vsel %vm52_vm1, %v51_v10, 0.0  ;;  %v44_v2 = vcvt.s32.f32 %v42_v58 }
  0x80   :  { %v56_v13 = vadd.f32 %v54_v12, %v37_v1 }
  0x81   :  { %60 = vrot.lane.b32.xlu1 %v57_v11, %s306_s1 }
  0x82   :  { %58 = vrot.lane.b32.xlu0 %v56_v13, %s306_s1 }
  0xf3   :  { %v61_v14 = vpop.permute.xlu1 %60 }
  0xf4   :  { %v59_v15 = vpop.permute.xlu0 %58 }
  0xf5   :  { %v63_v16 = vsel %vm62_vm2, %v59_v15, %v61_v14  ;;  %v64_v17 = vsel %vm62_vm2, %v61_v14, %v59_v15 }
  0xf6   :  { %v67_v18 = vsel %vm65_vm3, %v64_v17, 0.0  ;;  %v70_v19 = vadd.f32 %v63_v16, %v57_v11 }
  0xf7   :  { %v69_v20 = vadd.f32 %v67_v18, %v56_v13 }
  0xf8   :  { %73 = vrot.lane.b32.xlu2 %v70_v19, %s307_s2 }
  0xf9   :  { %71 = vrot.lane.b32.xlu1 %v69_v20, %s307_s2 }
 0x152   :  { %v74_v21 = vpop.permute.xlu2 %73 }
 0x16b   :  { %v72_v22 = vpop.permute.xlu1 %71 }
 0x16c   :  { %v76_v23 = vsel %vm75_vm4, %v72_v22, %v74_v21  ;;  %v77_v24 = vsel %vm75_vm4, %v74_v21, %v72_v22 }
 0x16d   :  { %v80_v25 = vsel %vm78_vm5, %v77_v24, 0.0  ;;  %v83_v26 = vadd.f32 %v76_v23, %v70_v19 }
 0x16e   :  { %v82_v27 = vadd.f32 %v80_v25, %v69_v20 }
 0x16f   :  { %86 = vrot.lane.b32.xlu0 %v83_v26, %s308_s20 }
 0x170   :  { %84 = vrot.lane.b32.xlu2 %v82_v27, %s308_s20 }
 0x1ca   :  { %v85_v28 = vpop.permute.xlu2 %84 }
 0x1e1   :  { %v87_v29 = vpop.permute.xlu0 %86 }
 0x1e2   :  { %v89_v30 = vsel %vm88_vm6, %v85_v28, %v87_v29  ;;  %v90_v31 = vsel %vm88_vm6, %v87_v29, %v85_v28 }
 0x1e3   :  { %v93_v32 = vsel %vm91_vm7, %v90_v31, 0.0  ;;  %v96_v33 = vadd.f32 %v89_v30, %v83_v26 }
 0x1e4   :  { %v95_v34 = vadd.f32 %v93_v32, %v82_v27 }
 0x1e5   :  { %99 = vrot.lane.b32.xlu2 %v96_v33, %s309_s21 }
 0x1e6   :  { %97 = vrot.lane.b32.xlu1 %v95_v34, %s309_s21 }
 0x23f   :  { %v100_v35 = vpop.permute.xlu2 %99 }
 0x258   :  { %v98_v36 = vpop.permute.xlu1 %97 }
 0x259   :  { %v102_v37 = vsel %vm101_vm8, %v98_v36, %v100_v35  ;;  %v103_v38 = vsel %vm101_vm8, %v100_v35, %v98_v36  ;;  %vm209_vm8 = vcmp.eq.s32.totalorder %v341_v5, 0 }
 0x25a   :  { %v106_v39 = vsel %vm104_vm9, %v103_v38, 0.0  ;;  %v109_v40 = vadd.f32 %v102_v37, %v96_v33  ;;  %v211_v37 = vld [vmem:[#allocation3] sm:$0xff] }
 0x25b   :  { %v108_v41 = vadd.f32 %v106_v39, %v95_v34 }
 0x25c   :  { %112 = vrot.lane.b32.xlu1 %v109_v40, %s310_s22 }
 0x25d   :  { %110 = vrot.lane.b32.xlu0 %v108_v41, %s310_s22 }
 0x264   :  { %145 = vperm.xlu1 %271, %v142_v44  }
 0x2ce   :  { %v113_v45 = vpop.permute.xlu1 %112 }
 0x2cf   :  { %v111_v46 = vpop.permute.xlu0 %110 }
 0x2d0   :  { %v115_v47 = vsel %vm114_vm11, %v111_v46, %v113_v45  ;;  %v116_v48 = vsel %vm114_vm11, %v113_v45, %v111_v46 }
 0x2d1   :  { %v119_v49 = vsel %vm117_vm12, %v116_v48, 0.0  ;;  %v122_v50 = vadd.f32 %v115_v47, %v109_v40  ;;  %v221_v40 = vld [vmem:[#allocation5] sm:$0xff] }
 0x2d2   :  { %v121_v51 = vadd.f32 %v119_v49, %v108_v41  ;;  %v222_v41 = vld [vmem:[#allocation5 + $0x8] sm:$0xff]  ;;  %v223_v43 = vsub.f32 0.0, %v221_v40 }
 0x2d3   :  { %125 = vrot.lane.b32.xlu0 %v122_v50, %s313_s23  ;;  %v224_v44 = vsub.f32 0.0, %v222_v41 }
 0x2d4   :  { %123 = vrot.lane.b32.xlu2 %v121_v51, %s313_s23  ;;  %v225_v49 = vmax.f32 %v223_v43, 0.0 }
 0x2d6   :  { %v146_v61 = vpop.permute.xlu1 %145 }
 0x2db   :  { %157 = vperm.xlu0 %273, %v39_v52  }
 0x2dc   :  { %166 = vperm.xlu2 %272, %v154_v53  }
 0x32e   :  { %v124_v54 = vpop.permute.xlu2 %123 }
 0x336   :  { %v167_v3 = vpop.permute.xlu2 %166 }
 0x345   :  { %v126_v55 = vpop.permute.xlu0 %125 }
 0x346   :  { %v128_v56 = vsel %vm127_vm13, %v124_v54, %v126_v55  ;;  %v129_v57 = vsel %vm127_vm13, %v126_v55, %v124_v54 }
 0x347   :  { %v132_v59 = vsel %vm130_vm14, %v129_v57, 0.0  ;;  %v135_v60 = vadd.f32 %v128_v56, %v122_v50  ;;  %v226_v50 = vmax.f32 %v224_v44, 0.0  ;;  %v227_v57 = vld [vmem:[#allocation4] sm:$0xff] }
 0x348   :  { %v134_v62 = vadd.f32 %v132_v59, %v121_v51 }
 0x34a   :  { %v141_v0 = vadd.f32 %v135_v60, %v134_v62  ;;  %v148_v1 = vadd.f32 %v146_v61, %v134_v62 }
 0x34c   :  { %v149_v4 = vadd.f32 %v146_v61, %v141_v0  ;;  %v162_v6 = vsub.f32 %v43_v63, %v148_v1 }
 0x34d   :  { %v158_v17 = vpop.permute.xlu0 %157 }
 0x34e   :  { %v163_v7 = vsub.f32 %v44_v2, %v149_v4  ;;  %v169_v8 = vadd.f32 %v167_v3, %v162_v6  ;;  %237 = vrot.lane.b32.xlu0 %v149_v4, %s305_s19  ;;  %v160_v24 = vsub.f32 %v158_v17, %v148_v1  ;;  %v161_v30 = vsub.f32 %v158_v17, %v149_v4 }
 0x350   :  { %v170_v9 = vadd.f32 %v167_v3, %v163_v7  ;;  %274 = vrcp.f32 %v169_v8  ;;  %v182_v15 = vand.u32 2147483648, %v169_v8  ;;  %v180_v19 = vand.u32 2147483647, %v169_v8 }
 0x351   :  { %vm176_vm1 = vweird.f32 %v169_v8 }
 0x352   :  { %276 = vrcp.f32 %v170_v9  ;;  %v196_v20 = vand.u32 2147483648, %v170_v9  ;;  %v194_v23 = vand.u32 2147483647, %v170_v9  ;;  %v183_v25 = vor.u32 1.1754944e-38, %v182_v15 }
 0x353   :  { %vm181_vm4 = vcmp.eq.f32.partialorder %v180_v19, 8.507059e+37  ;;  %vm190_vm5 = vweird.f32 %v170_v9 }
 0x354   :  { %v197_v29 = vor.u32 1.1754944e-38, %v196_v20  ;;  %vm195_vm7 = vcmp.eq.f32.partialorder %v194_v23, 8.507059e+37 }
 0x356   :  { %v275_v10 = vpop.eup %274 }
 0x357   :  { %v172_v11 = vmul.f32 %v275_v10, %v169_v8  ;;  %vm177_vm15 = vweird.f32 %v275_v10 }
 0x358   :  { %v277_v12 = vpop.eup %276  ;;  %vm178_vm3 = vmor %vm176_vm1, %vm177_vm15 }
 0x359   :  { %v173_v13 = vsub.f32 1.0, %v172_v11  ;;  %v186_v14 = vmul.f32 %v277_v12, %v170_v9  ;;  %vm191_vm2 = vweird.f32 %v277_v12 }
 0x35a   :  { %vm192_vm6 = vmor %vm190_vm5, %vm191_vm2 }
 0x35b   :  { %v187_v16 = vsub.f32 1.0, %v186_v14  ;;  %v174_v18 = vmul.f32 %v275_v10, %v173_v13 }
 0x35d   :  { %v175_v21 = vadd.f32 %v275_v10, %v174_v18  ;;  %v188_v22 = vmul.f32 %v277_v12, %v187_v16 }
 0x35f   :  { %v179_v26 = vsel %vm178_vm3, %v275_v10, %v175_v21  ;;  %v189_v27 = vadd.f32 %v277_v12, %v188_v22 }
 0x360   :  { %v184_v28 = vsel %vm181_vm4, %v183_v25, %v179_v26 }
 0x361   :  { %v193_v31 = vsel %vm192_vm6, %v277_v12, %v189_v27  ;;  %v199_v32 = vmul.f32 %v184_v28, %v160_v24 }
 0x362   :  { %v198_v33 = vsel %vm195_vm7, %v197_v29, %v193_v31 }
 0x363   :  { %v200_v34 = vmul.f32 %v198_v33, %v161_v30  ;;  %v201_v35 = vsub.f32 1.0, %v199_v32 }
 0x365   :  { %203 = vrot.lane.b32.xlu1 %v201_v35, %s305_s19  ;;  %v202_v36 = vsub.f32 1.0, %v200_v34 }
 0x367   :  { %205 = vrot.lane.b32.xlu2 %v202_v36, %s305_s19 }
 0x36d   :  { %214 = vperm.xlu1 %271, %v211_v37  }
 0x375   :  { %242 = vrot.lane.b32.xlu1 %v202_v36, %s305_s19 }
 0x3c0   :  { %v238_v38 = vpop.permute.xlu0 %237 }
 0x3c1   :  { %240 = vst.msk [vmem:[#allocation2] sm:$0xff] %vm32_vm10, %v238_v38  ;;  %v206_v42 = vpop.permute.xlu2 %205 }
 0x3d7   :  { %v204_v39 = vpop.permute.xlu1 %203 }
 0x3d8   :  { %v207_v45 = vsel %vm49_vm0, %v204_v39, %v206_v42  ;;  %v208_v46 = vsel %vm49_vm0, %v206_v42, %v204_v39 }
 0x3d9   :  { %v220_v47 = vsub.f32 %v202_v36, %v207_v45 }
 0x3db   :  { %v229_v54 = vmul.f32 %v226_v50, %v220_v47 }
 0x3df   :  { %v215_v48 = vpop.permute.xlu1 %214 }
 0x3e0   :  { %v217_v51 = vsel %vm209_vm8, %v215_v48, %v208_v46 }
 0x3e1   :  { %v219_v52 = vsub.f32 %v201_v35, %v217_v51 }
 0x3e3   :  { %v228_v53 = vmul.f32 %v225_v49, %v219_v52 }
 0x3e5   :  { %v230_v55 = vadd.f32 %v229_v54, %v228_v53 }
 0x3e7   :  { %231 = vadd.xlane.f32.xlu2 %v230_v55  ;;  %v243_v56 = vpop.permute.xlu1 %242 }
 0x3e8   :  { %245 = vst.msk [vmem:[#allocation3] sm:$0xff] %vm32_vm10, %v243_v56 }
 0x45a   :  { %v232_v58 = vpop.xlane.xlu2 %231 }
 0x45b   :  { %v233_v59 = vadd.f32 %v232_v58, %v227_v57 }
 0x45d   :  { %235 = vst.msk [vmem:[#allocation4] sm:$0xff] %vm32_vm10, %v233_v59 }
 0x464   :  { %v249_v5 = vld [vmem:[#allocation4] sm:$0xff] }
 0x465   :  { %250 = vst.msk [vmem:[%s388_s3] sm:$0xff] %vm32_vm10, %v249_v5 }
 0x466   :  { %255 = vsyncpa [#allocation6], 1 }

</bundles_post_ra>
